<compile_context>
chip_gen: v7x
topology: tpu7x:2x2x1
jax: 0.10.0
libtpu: 0.0.40
codegen_flags: <defaults>
</compile_context>

<pallas_src>
import functools

import jax
import jax.numpy as jnp
from jax.experimental import pallas as pl
from jax.experimental.pallas import tpu as pltpu

_LANE = 128
_SUBLANE = 8


# --------------------------------------------------------------------------- #
# Kernel
# --------------------------------------------------------------------------- #
def _attn_kernel(g_ref, x_ref, wg_ref, wx_ref, b_ref, wpsi_ref, bpsi_ref, o_ref):
    # g_ref: (nb, F_g, T)   x_ref: (nb, F_l, T)   channels on sublanes, pixels on lanes
    # wg_ref: (F_int, F_g)  wx_ref: (F_int, F_l)  b_ref: (F_int, 1)   (BN folded)
    # wpsi_ref: (1, F_int)  bpsi_ref: (1,) scalar in SMEM
    nb = g_ref.shape[0]
    for i in range(nb):                       # static unroll; nb is small
        gi = g_ref[i]                         # (F_g, T)
        xi = x_ref[i]                         # (F_l, T)
        h = (jnp.dot(wg_ref[...], gi, preferred_element_type=jnp.float32)
             + jnp.dot(wx_ref[...], xi, preferred_element_type=jnp.float32)
             + b_ref[...])
        h = jnp.maximum(h, 0.0)               # ReLU, (F_int, T)
        logits = jnp.dot(wpsi_ref[...], h,
                         preferred_element_type=jnp.float32) + bpsi_ref[0]
        psi = jax.nn.sigmoid(logits)          # (1, T)
        o_ref[i] = (xi * psi).astype(o_ref.dtype)   # sublane-broadcast gate


# --------------------------------------------------------------------------- #
# Planning helpers (pure Python, run outside jit)
# --------------------------------------------------------------------------- #
def _round_up(v, m):
    return (v + m - 1) // m * m


def _vmem_capacity_bytes():
    """Per-generation VMEM capacity (64 MiB v7x, 128 MiB v5e/v6e)."""
    try:
        info = pltpu.get_tpu_info()
        cap = int(getattr(info, "vmem_capacity_bytes", 0))
        if cap > 0:
            return cap
    except Exception:
        pass
    return 64 * 1024 * 1024  # conservative fallback (v7x per-core VMEM)


def _plan(N, HW, F_g, F_l, F_int, itemsize=4, max_pix_per_step=65536):
    """Pick (nb, tile_pix, vmem_limit_bytes) from a VMEM byte budget.

    Accounts for every VMEM consumer of one grid step: double-buffered g / x /
    out blocks (sublane-padded rows), the (F_int, T) ReLU intermediate and
    temporaries, and the psi row.
    """
    cap = _vmem_capacity_bytes()
    budget = int(0.7 * cap)                   # headroom vs. physical VMEM

    rows_per_pix = (2 * _round_up(F_g, _SUBLANE)        # g block  (double-buffered)
                    + 2 * _round_up(F_l, _SUBLANE)      # x block  (double-buffered)
                    + 2 * _round_up(F_l, _SUBLANE)      # out block (double-buffered)
                    + 2 * _round_up(F_int, _SUBLANE)    # h + relu/psi temporaries
                    + 2 * _SUBLANE)                     # psi row + slack
    per_pix_bytes = rows_per_pix * itemsize

    budget_pix = max(_LANE, budget // per_pix_bytes)
    budget_pix = min(budget_pix, max_pix_per_step)

    if HW <= budget_pix:
        # Small feature map: full pixel axis per block, batch several images.
        tile_pix = HW
        nb = max(1, min(N, budget_pix // HW))
    else:
        # Large feature map: fat lane-aligned pixel tiles, one image per step.
        tile_pix = max(_LANE, (budget_pix // _LANE) * _LANE)
        nb = 1

    # Megacore (v7x has 2 TensorCores): keep >= 2 parallel grid steps if possible.
    def _steps(nb_, tp_):
        return pl.cdiv(N, nb_) * pl.cdiv(HW, tp_)

    if _steps(nb, tile_pix) < 2:
        if N >= 2:
            nb = min(nb, max(1, N // 2))
        elif HW >= 2 * _LANE and tile_pix == HW:
            tile_pix = _round_up(pl.cdiv(HW, 2), _LANE)

    vmem_limit = int(min(cap, max(int(0.85 * cap), 32 * 1024 * 1024)))
    return int(nb), int(tile_pix), vmem_limit


def _fold_bn(w, b, gamma, beta, mean, var, eps=1e-5):
    # conv(y) = y @ w + b ; BN(z) = gamma*(z-mean)/sqrt(var+eps)+beta
    scale = gamma / jnp.sqrt(var + eps)
    w_f = w * scale[None, :]
    b_f = (b - mean) * scale + beta
    return w_f, b_f


# --------------------------------------------------------------------------- #
# Pallas wrapper
# --------------------------------------------------------------------------- #
@functools.partial(jax.jit, static_argnames=("nb", "tile_pix", "vmem_limit"))
def _attention_impl(g, x, params, *, nb, tile_pix, vmem_limit):
    N, F_g, H, W = g.shape
    F_l = x.shape[1]
    HW = H * W

    wg, bg = _fold_bn(params["wg"], params["bg"], params["gamma_g"],
                      params["beta_g"], params["mean_g"], params["var_g"])
    wx, bx = _fold_bn(params["wx"], params["bx"], params["gamma_x"],
                      params["beta_x"], params["mean_x"], params["var_x"])
    wpsi, bpsi = _fold_bn(params["wpsi"], params["bpsi"], params["gamma_p"],
                          params["beta_p"], params["mean_p"], params["var_p"])
    F_int = wg.shape[1]

    # NCHW -> (N, C, H*W): a pure reshape, no HBM transpose traffic.
    g3 = g.reshape(N, F_g, HW)
    x3 = x.reshape(N, F_l, HW)

    # Weights transposed so the matmuls are W^T @ X_tile (channels on sublanes).
    wg_t = wg.T                               # (F_int, F_g)
    wx_t = wx.T                               # (F_int, F_l)
    b_cat = (bg + bx).reshape(F_int, 1)       # combined gating bias, (F_int, 1)
    wpsi_t = wpsi.T                           # (1, F_int)
    bpsi_s = bpsi.reshape(1)                  # scalar -> SMEM

    grid = (pl.cdiv(N, nb), pl.cdiv(HW, tile_pix))
    const = lambda n, p: (0, 0)

    cost = pl.CostEstimate(
        flops=2 * N * HW * F_int * (F_g + F_l + 1),
        transcendentals=N * HW,
        bytes_accessed=4 * N * HW * (F_g + 2 * F_l),
    )

    out3 = pl.pallas_call(
        _attn_kernel,
        out_shape=jax.ShapeDtypeStruct((N, F_l, HW), x.dtype),
        grid_spec=pltpu.PrefetchScalarGridSpec(
            num_scalar_prefetch=0,
            grid=grid,
            in_specs=[
                pl.BlockSpec((nb, F_g, tile_pix), lambda n, p: (n, 0, p)),
                pl.BlockSpec((nb, F_l, tile_pix), lambda n, p: (n, 0, p)),
                pl.BlockSpec((F_int, F_g), const),
                pl.BlockSpec((F_int, F_l), const),
                pl.BlockSpec((F_int, 1), const),
                pl.BlockSpec((1, F_int), const),
                pl.BlockSpec(memory_space=pltpu.MemorySpace.SMEM),
            ],
            out_specs=pl.BlockSpec((nb, F_l, tile_pix), lambda n, p: (n, 0, p)),
        ),
        compiler_params=pltpu.CompilerParams(
            dimension_semantics=("parallel", "parallel"),
            vmem_limit_bytes=vmem_limit),
        cost_estimate=cost,
    )(g3, x3, wg_t, wx_t, b_cat, wpsi_t, bpsi_s)

    return out3.reshape(N, F_l, H, W)


def attention_block(g, x, params):
    """g: (N, F_g, H, W), x: (N, F_l, H, W)  ->  (N, F_l, H, W)."""
    N, F_g, H, W = g.shape
    F_l = x.shape[1]
    F_int = params["wg"].shape[1]
    nb, tile_pix, vmem_limit = _plan(N, H * W, F_g, F_l, F_int)
    return _attention_impl(g, x, params, nb=nb, tile_pix=tile_pix,
                           vmem_limit=vmem_limit)


# --------------------------------------------------------------------------- #
# Params / reference / demo
# --------------------------------------------------------------------------- #
def _init_params(key, F_g, F_l, F_int):
    ks = jax.random.split(key, 9)
    p = {
        # 1x1 conv weights stored as (C_in, C_out); PyTorch stores (C_out, C_in, 1, 1)
        "wg": jax.random.normal(ks[0], (F_g, F_int), jnp.float32) * 0.1,
        "bg": jax.random.normal(ks[1], (F_int,), jnp.float32) * 0.1,
        "wx": jax.random.normal(ks[2], (F_l, F_int), jnp.float32) * 0.1,
        "bx": jax.random.normal(ks[3], (F_int,), jnp.float32) * 0.1,
        "wpsi": jax.random.normal(ks[4], (F_int, 1), jnp.float32) * 0.1,
        "bpsi": jax.random.normal(ks[5], (1,), jnp.float32) * 0.1,
        # BatchNorm affine + running stats (eval-mode semantics)
        "gamma_g": 1.0 + 0.05 * jax.random.normal(ks[6], (F_int,), jnp.float32),
        "beta_g": jnp.linspace(-0.1, 0.1, F_int, dtype=jnp.float32),
        "mean_g": jnp.linspace(-0.05, 0.05, F_int, dtype=jnp.float32),
        "var_g": jnp.full((F_int,), 1.2, jnp.float32),
        "gamma_x": 1.0 + 0.05 * jax.random.normal(ks[7], (F_int,), jnp.float32),
        "beta_x": jnp.linspace(0.1, -0.1, F_int, dtype=jnp.float32),
        "mean_x": jnp.linspace(0.05, -0.05, F_int, dtype=jnp.float32),
        "var_x": jnp.full((F_int,), 0.9, jnp.float32),
        "gamma_p": 1.0 + 0.05 * jax.random.normal(ks[8], (1,), jnp.float32),
        "beta_p": jnp.array([0.02], jnp.float32),
        "mean_p": jnp.array([0.01], jnp.float32),
        "var_p": jnp.array([1.1], jnp.float32),
    }
    return p


def _reference(g, x, params, eps=1e-5):
    """Pure-JAX reference matching the PyTorch forward (eval-mode BN)."""
    def conv_bn(y, w, b, gamma, beta, mean, var):
        z = jnp.einsum("nchw,cd->ndhw", y, w) + b[None, :, None, None]
        return (gamma[None, :, None, None] * (z - mean[None, :, None, None])
                / jnp.sqrt(var[None, :, None, None] + eps)
                + beta[None, :, None, None])

    g1 = conv_bn(g, params["wg"], params["bg"], params["gamma_g"],
                 params["beta_g"], params["mean_g"], params["var_g"])
    x1 = conv_bn(x, params["wx"], params["bx"], params["gamma_x"],
                 params["beta_x"], params["mean_x"], params["var_x"])
    h = jnp.maximum(g1 + x1, 0.0)
    psi = conv_bn(h, params["wpsi"], params["bpsi"], params["gamma_p"],
                  params["beta_p"], params["mean_p"], params["var_p"])
    psi = jax.nn.sigmoid(psi)
    return x * psi


if __name__ == "__main__":
    # Small shapes consistent with the module: F_g = F_l = 4, F_int = 32.
    N, F_g, F_l, F_int, H, W = 2, 4, 4, 32, 16, 16
    key = jax.random.PRNGKey(0)
    kg, kx, kp = jax.random.split(key, 3)

    g = jax.random.normal(kg, (N, F_g, H, W), jnp.float32)
    x = jax.random.normal(kx, (N, F_l, H, W), jnp.float32)
    params = _init_params(kp, F_g, F_l, F_int)

    out = attention_block(g, x, params)
    out = jax.block_until_ready(out)

    ref = _reference(g, x, params)
    assert out.shape == (N, F_l, H, W)
    assert jnp.allclose(out, ref, atol=1e-4, rtol=1e-4), (
        float(jnp.max(jnp.abs(out - ref))))

    print("KERNEL_OK")
</pallas_src>

<mosaic_0001>
module attributes {stable_mosaic.version = 11 : i64} {
  func.func @_attn_kernel(%arg0: i32, %arg1: i32, %arg2: memref<1x4x256xf32, #tpu.memory_space<vmem>>, %arg3: memref<1x4x256xf32, #tpu.memory_space<vmem>>, %arg4: memref<32x4xf32, #tpu.memory_space<vmem>>, %arg5: memref<32x4xf32, #tpu.memory_space<vmem>>, %arg6: memref<32x1xf32, #tpu.memory_space<vmem>>, %arg7: memref<1x32xf32, #tpu.memory_space<vmem>>, %arg8: memref<1xf32, #tpu.memory_space<smem>>, %arg9: memref<1x4x256xf32, #tpu.memory_space<vmem>>) attributes {dimension_semantics = [#tpu.dimension_semantics<parallel>, #tpu.dimension_semantics<parallel>], iteration_bounds = array<i64: 2, 1>, scalar_prefetch = 0 : i64, scratch_operands = 0 : i64, tpu.core_type = #tpu.core_type<tc>, window_params = [{transform_indices = @transform_0, window_bounds = array<i64: 1, 4, 256>}, {transform_indices = @transform_1, window_bounds = array<i64: 1, 4, 256>}, {pipeline_mode = #tpu.pipeline_mode<synchronous>, transform_indices = @transform_2, window_bounds = array<i64: 32, 4>}, {pipeline_mode = #tpu.pipeline_mode<synchronous>, transform_indices = @transform_3, window_bounds = array<i64: 32, 4>}, {pipeline_mode = #tpu.pipeline_mode<synchronous>, transform_indices = @transform_4, window_bounds = array<i64: 32, 1>}, {pipeline_mode = #tpu.pipeline_mode<synchronous>, transform_indices = @transform_5, window_bounds = array<i64: 1, 32>}, {transform_indices = @transform_6, window_bounds = array<i64: 1>}, {transform_indices = @transform_7, window_bounds = array<i64: 1, 4, 256>}]} {
    %c0 = arith.constant 0 : index
    %c0_0 = arith.constant 0 : index
    %c0_1 = arith.constant 0 : index
    %0 = vector.load %arg2[%c0, %c0_0, %c0_1] : memref<1x4x256xf32, #tpu.memory_space<vmem>>, vector<1x4x256xf32>
    %1 = vector.shape_cast %0 : vector<1x4x256xf32> to vector<4x256xf32>
    %c0_2 = arith.constant 0 : index
    %c0_3 = arith.constant 0 : index
    %c0_4 = arith.constant 0 : index
    %2 = vector.load %arg3[%c0_2, %c0_3, %c0_4] : memref<1x4x256xf32, #tpu.memory_space<vmem>>, vector<1x4x256xf32>
    %3 = vector.shape_cast %2 : vector<1x4x256xf32> to vector<4x256xf32>
    %c0_5 = arith.constant 0 : index
    %c0_6 = arith.constant 0 : index
    %4 = vector.load %arg4[%c0_5, %c0_6] : memref<32x4xf32, #tpu.memory_space<vmem>>, vector<32x4xf32>
    %cst = arith.constant dense<0.000000e+00> : vector<32x256xf32>
    %5 = tpu.matmul %4, %1, %cst {dimension_numbers = #tpu.dot_dimension_numbers<[1], [0], [0], [1], [0, 0, 1, 1], [], []>} : vector<32x4xf32>, vector<4x256xf32>, vector<32x256xf32> -> vector<32x256xf32>
    %c0_7 = arith.constant 0 : index
    %c0_8 = arith.constant 0 : index
    %6 = vector.load %arg5[%c0_7, %c0_8] : memref<32x4xf32, #tpu.memory_space<vmem>>, vector<32x4xf32>
    %cst_9 = arith.constant dense<0.000000e+00> : vector<32x256xf32>
    %7 = tpu.matmul %6, %3, %cst_9 {dimension_numbers = #tpu.dot_dimension_numbers<[1], [0], [0], [1], [0, 0, 1, 1], [], []>} : vector<32x4xf32>, vector<4x256xf32>, vector<32x256xf32> -> vector<32x256xf32>
    %8 = arith.addf %5, %7 : vector<32x256xf32>
    %c0_10 = arith.constant 0 : index
    %c0_11 = arith.constant 0 : index
    %9 = vector.load %arg6[%c0_10, %c0_11] : memref<32x1xf32, #tpu.memory_space<vmem>>, vector<32x1xf32>
    %10 = vector.broadcast %9 : vector<32x1xf32> to vector<32x256xf32>
    %11 = arith.addf %8, %10 : vector<32x256xf32>
    %cst_12 = arith.constant 0.000000e+00 : f32
    %12 = vector.broadcast %cst_12 : f32 to vector<32x256xf32>
    %13 = arith.maximumf %11, %12 : vector<32x256xf32>
    %c0_13 = arith.constant 0 : index
    %c0_14 = arith.constant 0 : index
    %14 = vector.load %arg7[%c0_13, %c0_14] : memref<1x32xf32, #tpu.memory_space<vmem>>, vector<1x32xf32>
    %cst_15 = arith.constant dense<0.000000e+00> : vector<1x256xf32>
    %15 = tpu.matmul %14, %13, %cst_15 {dimension_numbers = #tpu.dot_dimension_numbers<[1], [0], [0], [1], [0, 0, 1, 1], [], []>} : vector<1x32xf32>, vector<32x256xf32>, vector<1x256xf32> -> vector<1x256xf32>
    %c0_16 = arith.constant 0 : index
    %16 = memref.load %arg8[%c0_16] : memref<1xf32, #tpu.memory_space<smem>>
    %17 = vector.broadcast %16 : f32 to vector<1x256xf32>
    %18 = arith.addf %15, %17 : vector<1x256xf32>
    %19 = arith.negf %18 : vector<1x256xf32>
    %20 = math.exp %19 : vector<1x256xf32>
    %cst_17 = arith.constant 1.000000e+00 : f32
    %21 = vector.broadcast %cst_17 : f32 to vector<1x256xf32>
    %22 = arith.addf %21, %20 : vector<1x256xf32>
    %23 = arith.divf %21, %22 : vector<1x256xf32>
    %24 = vector.broadcast %23 : vector<1x256xf32> to vector<4x256xf32>
    %25 = arith.mulf %3, %24 : vector<4x256xf32>
    %c0_18 = arith.constant 0 : index
    %c0_19 = arith.constant 0 : index
    %c0_20 = arith.constant 0 : index
    %26 = vector.load %arg9[%c0_18, %c0_19, %c0_20] : memref<1x4x256xf32, #tpu.memory_space<vmem>>, vector<1x4x256xf32>
    %27 = vector.shape_cast %26 : vector<1x4x256xf32> to vector<4x256xf32>
    %28 = vector.shape_cast %25 : vector<4x256xf32> to vector<1x4x256xf32>
    tpu.vector_store %arg9[%c0_18, %c0_19, %c0_20], %28 {strides = array<i32>} : memref<1x4x256xf32, #tpu.memory_space<vmem>>, vector<1x4x256xf32>,
    return
  }
  func.func @transform_0(%arg0: i32, %arg1: i32) -> (i32, i32, i32) {
    %c0_i32 = arith.constant 0 : i32
    %c0_i32_0 = arith.constant 0 : i32
    return %arg0, %c0_i32, %arg1 : i32, i32, i32
  }
  func.func @transform_1(%arg0: i32, %arg1: i32) -> (i32, i32, i32) {
    %c0_i32 = arith.constant 0 : i32
    %c0_i32_0 = arith.constant 0 : i32
    return %arg0, %c0_i32, %arg1 : i32, i32, i32
  }
  func.func @transform_2(%arg0: i32, %arg1: i32) -> (i32, i32) {
    %c0_i32 = arith.constant 0 : i32
    %c0_i32_0 = arith.constant 0 : i32
    %c0_i32_1 = arith.constant 0 : i32
    return %c0_i32, %c0_i32_0 : i32, i32
  }
  func.func @transform_3(%arg0: i32, %arg1: i32) -> (i32, i32) {
    %c0_i32 = arith.constant 0 : i32
    %c0_i32_0 = arith.constant 0 : i32
    %c0_i32_1 = arith.constant 0 : i32
    return %c0_i32, %c0_i32_0 : i32, i32
  }
  func.func @transform_4(%arg0: i32, %arg1: i32) -> (i32, i32) {
    %c0_i32 = arith.constant 0 : i32
    %c0_i32_0 = arith.constant 0 : i32
    %c0_i32_1 = arith.constant 0 : i32
    return %c0_i32, %c0_i32_0 : i32, i32
  }
  func.func @transform_5(%arg0: i32, %arg1: i32) -> (i32, i32) {
    %c0_i32 = arith.constant 0 : i32
    %c0_i32_0 = arith.constant 0 : i32
    %c0_i32_1 = arith.constant 0 : i32
    return %c0_i32, %c0_i32_0 : i32, i32
  }
  func.func @transform_6(%arg0: i32, %arg1: i32) -> i32 {
    %c0_i32 = arith.constant 0 : i32
    %c0_i32_0 = arith.constant 0 : i32
    return %c0_i32 : i32
  }
  func.func @transform_7(%arg0: i32, %arg1: i32) -> (i32, i32, i32) {
    %c0_i32 = arith.constant 0 : i32
    %c0_i32_0 = arith.constant 0 : i32
    return %arg0, %c0_i32, %arg1 : i32, i32, i32
  }
}

</mosaic_0001>

<bundles_post_ra>
// kernel: _attention_impl.1
= control target key start
LH: loop header
LB: loop body
LE: loop exit
PB: predicated region body
PF: predicated region fallthrough
CT: control target
= control target key end

     0   :  { %s984_s26 = smov 0   ;;  %s986_s27 = smov 0   ;;  %s1078_s0 = inlined_call_operand.vmem [shape: f32[2,4,256], index: 0, kind: input, shape index: {}]   ;;  %s1079_s1 = inlined_call_operand.vmem [shape: f32[2,4,256], index: 1, kind: input, shape index: {}]   ;;  %s1080_s2 = inlined_call_operand.vmem [shape: f32[32,4], index: 2, kind: input, shape index: {}]   ;;  %s1081_s3 = inlined_call_operand.vmem [shape: f32[32,4], index: 3, kind: input, shape index: {}]   ;;  %s1082_s4 = inlined_call_operand.vmem [shape: f32[32,1], index: 4, kind: input, shape index: {}]   ;;  %s1083_s5 = inlined_call_operand.vmem [shape: f32[1,32], index: 5, kind: input, shape index: {}]   ;;  %s1084_s6 = inlined_call_operand.<no memory space> [shape: f32[1], index: 6, kind: input, shape index: {}]   ;;  %s1085_s7 = inlined_call_operand.vmem [shape: f32[2,4,256], index: 7, kind: output, shape index: {}]  }
   0x1   :  { %12 = sst [smem:[#allocation2]] %s1084_s6  ;;  %s988_s28 = smov 0  }
   0x2 LB: > { %s30_s6 = sadd.s32 1, %s933_s27  ;;  %p834_p0 = scmp.ge.s32.totalorder %s937_s28, 1  ;;  %s937_s28 = sphi %s988_s28, %s18_s28   ;;  %s933_s27 = sphi %s986_s27, %s1087_s27   ;;  %s929_s26 = sphi %s984_s26, %s1086_s26  }
   0x3   : > { %p32_p1 = scmp.ge.s32.totalorder %s30_s6, 2  ;;  %p276_p2 = scmp.lt.s32.totalorder %s937_s28, 3 }
   0x5   : > { %s1089_s6 = smov (%p32_p1, %s30_s6), 0  ;;  %p277_p3 = pnand %p834_p0, %p276_p2 }
   0x6   : > { %p326_p4 = scmp.lt.s32.totalorder (!%p277_p3), %s929_s26, 1  ;;  %v939_v0 = vmov (!%p277_p3), 0.0   ;;  %v940_v1 = vmov (!%p277_p3), 0   ;;  %v581_v2 = vld [vmem:[%s1082_s4] sm:$0xff] (!%p277_p3)  ;;  %v583_v3 = vld [vmem:[%s1082_s4 + $0x10] sm:$0xff] (!%p277_p3)  ;;  %v582_v4 = vld [vmem:[%s1082_s4 + $0x8] sm:$0xff] (!%p277_p3) }
   0x7   : > { %280 = sbr.rel (%p277_p3) target bundleno = 508 (0x1fc), region = 48  ;;  %449 = vmatprep.mubr.f32.mxu1 (!%p277_p3), %v939_v0  ;;  %556 = vmatprep.mubr.f32.mxu0 (!%p277_p3), %v939_v0  ;;  %v584_v5 = vld [vmem:[%s1082_s4 + $0x18] sm:$0xff] (!%p277_p3)  ;;  %vm380_vm0 = vcmask (!%p277_p3), 1043456   ;;  %v361_v10 = vld [vmem:[%s1081_s3] sm:$0xff] (!%p277_p3)  ;;  %vm367_vm1 = vcmask (!%p277_p3), 31744   ;;  %v362_v12 = vld [vmem:[%s1081_s3 + $0x8] sm:$0xff] (!%p277_p3) }
   0x8   : > { %903 = vset.pattern.permute.xlu0 (!%p277_p3), %v940_v1  ;;  %904 = vset.pattern.permute.xlu1 (!%p277_p3), %v940_v1  ;;  %v357_v11 = vld [vmem:[%s1080_s2] sm:$0xff] (!%p277_p3)  ;;  %v358_v13 = vld [vmem:[%s1080_s2 + $0x8] sm:$0xff] (!%p277_p3)  ;;  %v363_v14 = vld [vmem:[%s1081_s3 + $0x10] sm:$0xff] (!%p277_p3)  ;;  %vm624_vm2 = vcmask (!%p277_p3), 261120   ;;  %s622_s19 = sld [smem:[#allocation2]] (!%p277_p3) }
   0x9   : > { %587 = vperm.xlu0 (!%p277_p3), %903, %v581_v2   ;;  %597 = vperm.xlu1 (!%p277_p3), %904, %v583_v3   ;;  %v359_v15 = vld [vmem:[%s1080_s2 + $0x10] sm:$0xff] (!%p277_p3)  ;;  %v364_v16 = vld [vmem:[%s1081_s3 + $0x18] sm:$0xff] (!%p277_p3)  ;;  %v621_v2 = vld [vmem:[%s1083_s5] sm:$0x1] (!%p277_p3) }
   0xa   : > { %v360_v17 = vld [vmem:[%s1080_s2 + $0x18] sm:$0xff] (!%p277_p3) }
   0xd   : > { %592 = vperm.xlu0 (!%p277_p3), %903, %v582_v4   ;;  %602 = vperm.xlu1 (!%p277_p3), %904, %v584_v5  }
   0xe   : > { %s1091_s26 = smov (!%p326_p4, %s929_s26), 1  ;;  %v623_v3 = vstv %s622_s19 }
   0xf   : > { %s1008_s10 = sshll.u32 %s1091_s26, 3 }
  0x10   : > { %s343_s13 = scalar_lea.vmem %s1079_s1, %s1008_s10  ;;  %s333_s20 = scalar_lea.vmem %s1078_s0, %s1008_s10 }
  0x11   : > { %v1020_v6 = vld [vmem:[%s343_s13] sm:$0xff]  ;;  %s353_s22 = scalar_lea.vmem %s1085_s7, %s1008_s10 }
  0x12   : > { %v366_v7 = vcombine.high %v1020_v6, %v1020_v6  ;;  %v355_v8 = vld [vmem:[%s333_s20] sm:$0xff] }
  0x13   : > { %v475_v9 = vcombine.high %v355_v8, %v355_v8 }
  0x14   : > { %841 = vmatprep.subr.msk.mxu1 %vm380_vm0, %v366_v7 }
  0x15   : > { %847 = vmatprep.subr.msk.mxu0 %vm380_vm0, %v475_v9  ;;  %842 = vmatpush1.msk.msra.mxu1 %vm380_vm0, %v1020_v6 }
  0x16   : > { %848 = vmatpush1.msk.msra.mxu0 %vm380_vm0, %v355_v8  ;;  %843 = vmatmul.mubr.msk.f32.vlgmr.msra.gmra.mrb[0].mxu1 %vm367_vm1, %v361_v10 }
  0x17   : > { %849 = vmatmul.mubr.msk.f32.vlgmr.msra.gmra.mrb[0].mxu0 %vm367_vm1, %v357_v11  ;;  %455 = vmatprep.mubr.f32.mxu1 %v939_v0 }
  0x18   : > { %562 = vmatprep.mubr.f32.mxu0 %v939_v0 }
  0x1a   : > { %844 = vmatmul.mubr.msk.f32.gmra.mrb[2].mxu1 %vm367_vm1, %v362_v12 }
  0x1b   : > { %850 = vmatmul.mubr.msk.f32.gmra.mrb[2].mxu0 %vm367_vm1, %v358_v13  ;;  %461 = vmatprep.mubr.f32.mxu1 %v939_v0 }
  0x1c   : > { %568 = vmatprep.mubr.f32.mxu0 %v939_v0 }
  0x1e   : > { %845 = vmatmul.mubr.msk.f32.gmra.mrb[4].mxu1 %vm367_vm1, %v363_v14  ;;  %v711_v14 = vlaneseq }
  0x1f   : > { %851 = vmatmul.mubr.msk.f32.gmra.mrb[4].mxu0 %vm367_vm1, %v359_v15  ;;  %467 = vmatprep.mubr.f32.mxu1 %v939_v0 }
  0x20   : > { %574 = vmatprep.mubr.f32.mxu0 %v939_v0 }
  0x22   : > { %846 = vmatmul.mubr.msk.f32.gmra.mrb[6].mxu1 %vm367_vm1, %v364_v16  ;;  %v712_v16 = vshrl.u32 %v711_v14, 7 }
  0x23   : > { %852 = vmatmul.mubr.msk.f32.gmra.mrb[6].mxu0 %vm367_vm1, %v360_v17  ;;  %692 = vmatprep.mubr.f32.mxu1 %v939_v0 }
  0x24   : > { %v713_v17 = vsub.s32 0, %v712_v16 }
  0x88   : > { %v588_v18 = vpop.permute.xlu0 %587  ;;  %v598_v35 = vpop.permute.xlu1 %597 }
  0x8c   : > { %v593_v25 = vpop.permute.xlu0 %592  ;;  %v603_v56 = vpop.permute.xlu1 %602 }
  0xe9   : > { %v451_v19 = vpop.f32.mrb[0].mxu1 }
  0xea   : > { %v558_v20 = vpop.f32.mrb[0].mxu0  ;;  %v453_v21 = vpop.f32.mrb[1].mxu1 }
  0xeb   : > { %v559_v22 = vadd.f32 %v558_v20, %v451_v19  ;;  %v560_v23 = vpop.f32.mrb[1].mxu0 }
  0xec   : > { %v561_v24 = vadd.f32 %v560_v23, %v453_v21 }
  0xed   : > { %v457_v26 = vpop.f32.mrb[2].mxu1  ;;  %v605_v29 = vadd.f32 %v588_v18, %v559_v22 }
  0xee   : > { %v564_v27 = vpop.f32.mrb[2].mxu0  ;;  %v459_v28 = vpop.f32.mrb[3].mxu1  ;;  %v606_v32 = vadd.f32 %v588_v18, %v561_v24 }
  0xef   : > { %v565_v30 = vadd.f32 %v564_v27, %v457_v26  ;;  %v566_v31 = vpop.f32.mrb[3].mxu0  ;;  %v613_v40 = vmax.f32 %v605_v29, 0.0 }
  0xf0   : > { %v567_v33 = vadd.f32 %v566_v31, %v459_v28  ;;  %v614_v44 = vmax.f32 %v606_v32, 0.0 }
  0xf1   : > { %v607_v34 = vadd.f32 %v593_v25, %v565_v30  ;;  %v463_v36 = vpop.f32.mrb[4].mxu1 }
  0xf2   : > { %v608_v37 = vadd.f32 %v593_v25, %v567_v33  ;;  %v570_v38 = vpop.f32.mrb[4].mxu0  ;;  %v465_v39 = vpop.f32.mrb[5].mxu1 }
  0xf3   : > { %v615_v41 = vmax.f32 %v607_v34, 0.0  ;;  %v571_v42 = vadd.f32 %v570_v38, %v463_v36  ;;  %v572_v43 = vpop.f32.mrb[5].mxu0 }
  0xf4   : > { %v616_v45 = vmax.f32 %v608_v37, 0.0  ;;  %v573_v46 = vadd.f32 %v572_v43, %v465_v39 }
  0xf5   : > { %v863_v47 = vpack.c.bf16 %v615_v41, %v613_v40  ;;  %v469_v48 = vpop.f32.mrb[6].mxu1  ;;  %v609_v52 = vadd.f32 %v598_v35, %v571_v42 }
  0xf6   : > { %v576_v49 = vpop.f32.mrb[6].mxu0  ;;  %v471_v50 = vpop.f32.mrb[7].mxu1  ;;  %v861_v51 = vpack.c.bf16 %v616_v45, %v614_v44  ;;  %v610_v55 = vadd.f32 %v598_v35, %v573_v46 }
  0xf7   : > { %v577_v53 = vadd.f32 %v576_v49, %v469_v48  ;;  %v578_v54 = vpop.f32.mrb[7].mxu0  ;;  %v617_v60 = vmax.f32 %v609_v52, 0.0 }
  0xf8   : > { %v579_v57 = vadd.f32 %v578_v54, %v471_v50  ;;  %862 = vmatprep.subr.bf16.mxu1 %v861_v51  ;;  %v618_v62 = vmax.f32 %v610_v55, 0.0 }
  0xf9   : > { %v611_v58 = vadd.f32 %v603_v56, %v577_v53  ;;  %864 = vmatpush1.bf16.msra.mxu1 %v863_v47 }
  0xfa   : > { %v612_v59 = vadd.f32 %v603_v56, %v579_v57 }
  0xfb   : > { %v619_v61 = vmax.f32 %v611_v58, 0.0 }
  0xfc   : > { %v620_v63 = vmax.f32 %v612_v59, 0.0 }
  0xfd   : > { %v867_v0 = vpack.c.bf16 %v619_v61, %v617_v60 }
  0xfe   : > { %v865_v1 = vpack.c.bf16 %v620_v63, %v618_v62 }
 0x100   : > { %866 = vmatprep.subr.bf16.mxu1 %v865_v1 }
 0x101   : > { %868 = vmatpush1.bf16.msra.mxu1 %v867_v0 }
 0x104   : > { %853 = vmatmul.mubr.msk.f32.vlgmr.msra.gmra.mrb[8].mxu1 %vm624_vm2, %v621_v2 }
 0x1d7   : > { %v694_v4 = vpop.f32.mrb[8].mxu1 }
 0x1d8   : > { %v695_v5 = vadd.f32 %v694_v4, %v623_v3  ;;  %v696_v7 = vpop.f32.mrb[9].mxu1 }
 0x1d9   : > { %v697_v8 = vadd.f32 %v696_v7, %v623_v3 }
 0x1da   : > { %v854_v9 = vmul.f32 -1.442695, %v695_v5 }
 0x1db   : > { %v855_v10 = vmul.f32 -1.442695, %v697_v8 }
 0x1dc   : > { %907 = vpow2.f32 %v854_v9 }
 0x1dd   : > { %909 = vpow2.f32 %v855_v10 }
 0x1e6   : > { %v908_v11 = vpop.eup %907 }
 0x1e7   : > { %v910_v12 = vpop.eup %909  ;;  %v705_v13 = vadd.f32 1.0, %v908_v11 }
 0x1e8   : > { %v706_v15 = vadd.f32 1.0, %v910_v12 }
 0x1e9   : > { %911 = vrcp.f32 %v705_v13 }
 0x1ea   : > { %913 = vrcp.f32 %v706_v15 }
 0x1f3   : > { %v912_v18 = vpop.eup %911 }
 0x1f4   : > { %v914_v19 = vpop.eup %913  ;;  %v714_v20 = vrot.slane %v912_v18, %v713_v17 }
 0x1f5   : > { %v718_v21 = vrot.slane %v914_v19, %v713_v17 }
 0x1f7   : > { %v721_v22 = vcombine.low %v714_v20, %v718_v21 }
 0x1f9   : > { %v723_v23 = vmul.f32 %v721_v22, %v1020_v6 }
 0x1fb   : > { %724 = vst [vmem:[%s353_s22] sm:$0xff] %v723_v23 }
 0x1fc PF: > { %s18_s28 = sadd.s32 1, %s937_s28   ;;  %s1086_s26 = smov %s933_s27 }
 0x1fd   : > { %p15_p5 = scmp.ge.s32.totalorder %s18_s28, 4   ;;  %s1087_s27 = smov %s1089_s6 }
 0x1ff   :  { %17 = sbr.rel (!%p15_p5) target bundleno = 2 (0x2), region = 81 }

</bundles_post_ra>
